<compile_context>
chip_gen: v5e
topology: v5e:2x2
jax: 0.10.0
libtpu: 0.0.40
codegen_flags: <defaults>
</compile_context>

<pallas_src>
import functools

import jax
import jax.numpy as jnp
from jax.experimental import pallas as pl
from jax.experimental.pallas import tpu as pltpu


def _token_dropout_kernel(seed_ref, x_ref, o_ref, *, p, value):
    # p is a compile-time Python float: specialize the trivial cases.
    if p <= 0.0:
        o_ref[...] = x_ref[...]
        return
    if p >= 1.0:
        o_ref[...] = jnp.full_like(o_ref, value)
        return

    tb, lane = x_ref.shape

    # Global flat element index for this block, computed in uint32.
    # (Local index fits int32 easily: tile is at most a few M elements.)
    base = pl.program_id(0).astype(jnp.uint32) * jnp.uint32(tb * lane)
    row = jax.lax.broadcasted_iota(jnp.int32, (tb, lane), 0)
    col = jax.lax.broadcasted_iota(jnp.int32, (tb, lane), 1)
    counter = base + (row * lane + col).astype(jnp.uint32)

    # Counter-based hash RNG: Weyl step + one xorshift-multiply round.
    # (~8 int32 VPU ops/element — comfortably HBM-bound on all generations.)
    seed = seed_ref[0].astype(jnp.uint32)
    h = counter * jnp.uint32(0x9E3779B9) + seed * jnp.uint32(0x85EBCA6B)
    h = (h ^ (h >> 16)) * jnp.uint32(0x21F0AAAD)
    h = h ^ (h >> 15)

    # Drop iff uniform < p  <=>  raw 32-bit hash < p * 2**32 (exact to 2^-32).
    thresh = jnp.uint32(int(p * 4294967296.0))
    o_ref[...] = jnp.where(h < thresh,
                           jnp.asarray(value, dtype=x_ref.dtype),
                           x_ref[...])


def _vmem_capacity_bytes():
    try:
        return int(pltpu.get_tpu_info().vmem_capacity_bytes)
    except Exception:
        return 64 << 20          # conservative (v7x-sized) fallback


def _pick_lane(n):
    """Lane width: a large multiple of 128 that divides N if possible."""
    for cand in (1024, 512, 256, 128):
        if n % cand == 0:
            return cand, False
    return 512, True             # no nice divisor: pad the flat array


def _pick_tile_rows(rows, lane, itemsize, vmem_capacity):
    """Largest row tile (dtype-aware sublane multiple) whose double-buffered
    in+out working set fits a generation-aware budget, with >= 2 grid steps
    whenever `rows` allows it (keeps both v7x TensorCores busy)."""
    sub = max(8, 32 // itemsize)          # f32:8, bf16:16, int8:32 sublanes
    if rows <= sub:
        return rows                       # single full-extent block (legal)
    budget = (32 << 20) if vmem_capacity >= (96 << 20) else (24 << 20)
    max_rows = budget // (4 * lane * itemsize)     # 2 buffers x (in + out)
    max_rows = min(max_rows, -(-rows // 2))        # ensure grid length >= 2
    tb = (max_rows // sub) * sub
    return max(tb, sub)


def token_dropout(x, seed, *, p=0.5, value=0, training=True):
    """Pallas implementation of TokenDropout.forward (functional)."""
    if not training:
        return x                           # eval mode: identity

    orig_shape = x.shape
    n = int(x.size)
    if n == 0:
        return x
    itemsize = jnp.dtype(x.dtype).itemsize

    # Flatten to a lane-dense 2-D slab.
    lane, needs_pad = _pick_lane(n)
    flat = x.reshape(-1)
    rows = pl.cdiv(n, lane)
    pad = rows * lane - n
    if needs_pad and pad:
        flat = jnp.pad(flat, (0, pad))
    x2 = flat.reshape(rows, lane)

    vmem_capacity = _vmem_capacity_bytes()
    tb = _pick_tile_rows(rows, lane, itemsize, vmem_capacity)
    grid = (pl.cdiv(rows, tb),)            # partial last block is masked

    tile_bytes = tb * lane * itemsize
    # 2 buffers x (in + out) plus headroom for the int32 hash temporaries.
    vmem_limit = min(max(6 * tile_bytes, 32 << 20), (vmem_capacity * 3) // 4)

    seed_arr = jnp.asarray([seed], dtype=jnp.int32)
    kernel = functools.partial(_token_dropout_kernel, p=float(p), value=value)

    out2 = pl.pallas_call(
        kernel,
        out_shape=jax.ShapeDtypeStruct((rows, lane), x.dtype),
        grid=grid,
        in_specs=[
            # scalar seed in SMEM
            pl.BlockSpec(memory_space=pltpu.MemorySpace.SMEM),
            # lane-dense row tile in VMEM
            pl.BlockSpec((tb, lane), lambda i: (i, 0)),
        ],
        out_specs=pl.BlockSpec((tb, lane), lambda i: (i, 0)),
        compiler_params=pltpu.CompilerParams(
            dimension_semantics=("parallel",),   # independent row tiles
            vmem_limit_bytes=vmem_limit,
        ),
        cost_estimate=pl.CostEstimate(
            flops=n,
            transcendentals=0,
            bytes_accessed=2 * n * itemsize,
        ),
    )(seed_arr, x2)

    out_flat = out2.reshape(-1)
    if pad:
        out_flat = out_flat[:n]
    return out_flat.reshape(orig_shape)


if __name__ == "__main__":
    key = jax.random.PRNGKey(0)

    # Small token tensor: batch=8, seq=128, int32 token ids in [1, 1000).
    x = jax.random.randint(key, (8, 128), 1, 1000, dtype=jnp.int32)

    p = 0.5
    value = 0

    # Training-mode forward (the hot path implemented in Pallas).
    y = token_dropout(x, seed=1234, p=p, value=value, training=True)
    y = jax.block_until_ready(y)

    # Sanity checks: shape/dtype preserved; every element is either the
    # original token or `value`; dropout rate roughly ~ p.
    assert y.shape == x.shape and y.dtype == x.dtype
    same_or_value = jnp.all((y == x) | (y == value))
    assert bool(same_or_value)
    drop_frac = float(jnp.mean((y == value) & (x != value)))
    assert 0.3 < drop_frac < 0.7, f"unexpected drop fraction {drop_frac}"

    # Different seed => different mask.
    y2 = jax.block_until_ready(token_dropout(x, seed=4321, p=p, value=value,
                                             training=True))
    assert not bool(jnp.all(y2 == y))

    # Eval-mode forward is the identity.
    y_eval = jax.block_until_ready(token_dropout(x, seed=1234, p=p,
                                                 value=value, training=False))
    assert bool(jnp.all(y_eval == x))

    print("KERNEL_OK")
</pallas_src>

<mosaic_0001>
module attributes {stable_mosaic.version = 11 : i64} {
  func.func @_token_dropout_kernel(%arg0: i32, %arg1: memref<1xi32, #tpu.memory_space<smem>>, %arg2: memref<1x1024xi32, #tpu.memory_space<vmem>>, %arg3: memref<1x1024xi32, #tpu.memory_space<vmem>>) attributes {dimension_semantics = [#tpu.dimension_semantics<parallel>], iteration_bounds = array<i64: 1>, scalar_prefetch = 0 : i64, scratch_operands = 0 : i64, tpu.core_type = #tpu.core_type<tc>, window_params = [{transform_indices = @transform_0, window_bounds = array<i64: 1>}, {transform_indices = @transform_1, window_bounds = array<i64: 1, 1024>}, {transform_indices = @transform_2, window_bounds = array<i64: 1, 1024>}]} {
    %c1024_i32 = arith.constant 1024 : i32
    %0 = arith.muli %arg0, %c1024_i32 : i32
    %1 = tpu.iota {dimensions = array<i32: 0>} : vector<1x1024xi32>
    %2 = tpu.iota {dimensions = array<i32: 1>} : vector<1x1024xi32>
    %c1024_i32_0 = arith.constant 1024 : i32
    %3 = vector.broadcast %c1024_i32_0 : i32 to vector<1x1024xi32>
    %4 = arith.muli %1, %3 : vector<1x1024xi32>
    %5 = arith.addi %4, %2 : vector<1x1024xi32>
    %6 = vector.broadcast %0 : i32 to vector<1x1024xi32>
    %7 = arith.addi %6, %5 : vector<1x1024xi32>
    %c0 = arith.constant 0 : index
    %8 = memref.load %arg1[%c0] : memref<1xi32, #tpu.memory_space<smem>>
    %c-1640531527_i32 = arith.constant -1640531527 : i32
    %9 = vector.broadcast %c-1640531527_i32 : i32 to vector<1x1024xi32>
    %10 = arith.muli %7, %9 : vector<1x1024xi32>
    %c-2048144789_i32 = arith.constant -2048144789 : i32
    %11 = arith.muli %8, %c-2048144789_i32 : i32
    %12 = vector.broadcast %11 : i32 to vector<1x1024xi32>
    %13 = arith.addi %10, %12 : vector<1x1024xi32>
    %c16_i32 = arith.constant 16 : i32
    %14 = vector.broadcast %c16_i32 : i32 to vector<1x1024xi32>
    %15 = arith.shrui %13, %14 : vector<1x1024xi32>
    %16 = arith.xori %13, %15 : vector<1x1024xi32>
    %c569420461_i32 = arith.constant 569420461 : i32
    %17 = vector.broadcast %c569420461_i32 : i32 to vector<1x1024xi32>
    %18 = arith.muli %16, %17 : vector<1x1024xi32>
    %c15_i32 = arith.constant 15 : i32
    %19 = vector.broadcast %c15_i32 : i32 to vector<1x1024xi32>
    %20 = arith.shrui %18, %19 : vector<1x1024xi32>
    %21 = arith.xori %18, %20 : vector<1x1024xi32>
    %c-2147483648_i32 = arith.constant -2147483648 : i32
    %22 = vector.broadcast %c-2147483648_i32 : i32 to vector<1x1024xi32>
    %23 = arith.cmpi ult, %21, %22 : vector<1x1024xi32>
    %c0_1 = arith.constant 0 : index
    %c0_2 = arith.constant 0 : index
    %24 = vector.load %arg2[%c0_1, %c0_2] : memref<1x1024xi32, #tpu.memory_space<vmem>>, vector<1x1024xi32>
    %c0_i32 = arith.constant 0 : i32
    %25 = vector.broadcast %c0_i32 : i32 to vector<1x1024xi32>
    %26 = arith.select %23, %25, %24 : vector<1x1024xi1>, vector<1x1024xi32>
    %c0_3 = arith.constant 0 : index
    %c0_4 = arith.constant 0 : index
    %27 = vector.load %arg3[%c0_3, %c0_4] : memref<1x1024xi32, #tpu.memory_space<vmem>>, vector<1x1024xi32>
    tpu.vector_store %arg3[%c0_3, %c0_4], %26 {strides = array<i32>} : memref<1x1024xi32, #tpu.memory_space<vmem>>, vector<1x1024xi32>,
    return
  }
  func.func @transform_0(%arg0: i32) -> i32 {
    %c0_i32 = arith.constant 0 : i32
    %c0_i32_0 = arith.constant 0 : i32
    return %c0_i32 : i32
  }
  func.func @transform_1(%arg0: i32) -> (i32, i32) {
    %c0_i32 = arith.constant 0 : i32
    %c0_i32_0 = arith.constant 0 : i32
    return %arg0, %c0_i32 : i32, i32
  }
  func.func @transform_2(%arg0: i32) -> (i32, i32) {
    %c0_i32 = arith.constant 0 : i32
    %c0_i32_0 = arith.constant 0 : i32
    return %arg0, %c0_i32 : i32, i32
  }
}

</mosaic_0001>

<bundles_post_ra>
// kernel: tpu_custom_call.1
= control target key start
LH: loop header
LB: loop body
LE: loop exit
PB: predicated region body
PF: predicated region fallthrough
CT: control target
= control target key end

     0   :  { %8 = vsyncpa [#allocation4], 0  ;;  %s337_s0 = inlined_call_operand.<no memory space> [shape: s32[1], index: 0, kind: input, shape index: {}]   ;;  %s338_s1 = inlined_call_operand.hbm [shape: s32[1,1024], index: 1, kind: input, shape index: {}]   ;;  %s339_s2 = inlined_call_operand.hbm [shape: s32[1,1024], index: 2, kind: output, shape index: {}]  }
   0x1   :  { %9 = vsyncpa [#allocation5], 0  ;;  %s17_s11 = sshll.u32 %s338_s1, 4  ;;  %s258_s12 = smov [#allocation3]   ;;  %s18_s11 = int_to_ptr.hbm [resolvable:$true] %s17_s11 }
   0x2   :  { %s19_s13 = sshll.u32 %s258_s12, 4  ;;  %s20_s13 = int_to_ptr.vmem [resolvable:$true] %s19_s13 }
   0x3   :  { %22 = dma.hbm_to_vmem [thread:$0]  %s18_s11, 128, %s20_s13, [#allocation4]  }
   0x4   :  { %254 = dma.done.wait [#allocation4], 128  }
   0x5   :  { %255 = vsyncadd [#allocation4], 4294967168  ;;  %v28_v0 = vlaneseq  ;;  %s66_s16 = smul.u32 2246822507, %s337_s0  ;;  %vm164_vm0 = vcmask 1040384   ;;  %vm166_vm1 = vcmask 1042434  }
   0x6   :  { %vm168_vm2 = vcmask 1041408   ;;  %vm170_vm3 = vcmask 1044484   ;;  %vm172_vm4 = vcmask 1046534   ;;  %vm174_vm13 = vcmask 1045508   ;;  %s259_s0 = smov [#allocation6]   ;;  %s186_s19 = sshll.u32 %s339_s2, 4  ;;  %s187_s19 = int_to_ptr.hbm [resolvable:$true] %s186_s19 }
   0x7   :  { %v29_v1 = vshrl.u32 %v28_v0, 7  ;;  %v31_v2 = vand.u32 127, %v28_v0  ;;  %v67_v11 = vstv %s66_s16  ;;  %s184_s1 = sshll.u32 %s259_s0, 4  ;;  %vm176_vm14 = vcmask 1043456   ;;  %s185_s1 = int_to_ptr.vmem [resolvable:$true] %s184_s1 }
   0x9   :  { %v32_v3 = vadd.s32 128, %v31_v2  ;;  %v33_v4 = vadd.s32 256, %v31_v2  ;;  %v34_v5 = vadd.s32 384, %v31_v2  ;;  %v35_v6 = vadd.s32 512, %v31_v2 }
   0xa   :  { %v36_v7 = vadd.s32 640, %v31_v2  ;;  %v37_v8 = vadd.s32 768, %v31_v2  ;;  %v38_v9 = vadd.s32 896, %v31_v2  ;;  %v39_v10 = vmul.u32 1024, %v29_v1 }
   0xc   :  { %v40_v12 = vadd.s32 %v39_v10, %v31_v2  ;;  %v41_v13 = vadd.s32 %v39_v10, %v32_v3  ;;  %v42_v14 = vadd.s32 %v39_v10, %v33_v4  ;;  %v43_v15 = vadd.s32 %v39_v10, %v34_v5 }
   0xd   :  { %v44_v16 = vadd.s32 %v39_v10, %v35_v6  ;;  %v45_v17 = vadd.s32 %v39_v10, %v36_v7  ;;  %v46_v18 = vadd.s32 %v39_v10, %v37_v8  ;;  %v47_v19 = vadd.s32 %v39_v10, %v38_v9 }
   0xe   :  { %v58_v20 = vmul.u32 2654435769, %v40_v12  ;;  %v59_v21 = vmul.u32 2654435769, %v41_v13  ;;  %v60_v22 = vmul.u32 2654435769, %v42_v14 }
   0xf   :  { %v61_v23 = vmul.u32 2654435769, %v43_v15  ;;  %v62_v24 = vmul.u32 2654435769, %v44_v16  ;;  %v63_v25 = vmul.u32 2654435769, %v45_v17 }
  0x10   :  { %v64_v26 = vmul.u32 2654435769, %v46_v18  ;;  %v65_v27 = vmul.u32 2654435769, %v47_v19  ;;  %v68_v28 = vadd.s32 %v67_v11, %v58_v20  ;;  %v69_v29 = vadd.s32 %v67_v11, %v59_v21  ;;  %v140_v16 = vld [vmem:[#allocation3] sm:$0xff] }
  0x11   :  { %v70_v30 = vadd.s32 %v67_v11, %v60_v22  ;;  %v71_v31 = vadd.s32 %v67_v11, %v61_v23  ;;  %v72_v32 = vadd.s32 %v67_v11, %v62_v24  ;;  %v73_v33 = vadd.s32 %v67_v11, %v63_v25 }
  0x12   :  { %v74_v34 = vadd.s32 %v67_v11, %v64_v26  ;;  %v75_v35 = vadd.s32 %v67_v11, %v65_v27  ;;  %v76_v36 = vshrl.u32 %v68_v28, 16  ;;  %v77_v37 = vshrl.u32 %v69_v29, 16 }
  0x13   :  { %v78_v38 = vshrl.u32 %v70_v30, 16  ;;  %v79_v39 = vshrl.u32 %v71_v31, 16  ;;  %v80_v40 = vshrl.u32 %v72_v32, 16  ;;  %v81_v41 = vshrl.u32 %v73_v33, 16 }
  0x14   :  { %v82_v42 = vshrl.u32 %v74_v34, 16  ;;  %v83_v43 = vshrl.u32 %v75_v35, 16  ;;  %v84_v44 = vxor.u32 %v76_v36, %v68_v28  ;;  %v85_v45 = vxor.u32 %v77_v37, %v69_v29 }
  0x15   :  { %v86_v46 = vxor.u32 %v78_v38, %v70_v30  ;;  %v87_v47 = vxor.u32 %v79_v39, %v71_v31  ;;  %v88_v48 = vxor.u32 %v80_v40, %v72_v32  ;;  %v89_v49 = vxor.u32 %v81_v41, %v73_v33 }
  0x16   :  { %v90_v50 = vxor.u32 %v82_v42, %v74_v34  ;;  %v91_v51 = vxor.u32 %v83_v43, %v75_v35  ;;  %v92_v52 = vmul.u32 569420461, %v84_v44  ;;  %v93_v53 = vmul.u32 569420461, %v85_v45 }
  0x17   :  { %v94_v54 = vmul.u32 569420461, %v86_v46  ;;  %v95_v55 = vmul.u32 569420461, %v87_v47  ;;  %v96_v56 = vmul.u32 569420461, %v88_v48 }
  0x18   :  { %v97_v57 = vmul.u32 569420461, %v89_v49  ;;  %v98_v58 = vmul.u32 569420461, %v90_v50  ;;  %v99_v59 = vmul.u32 569420461, %v91_v51 }
  0x19   :  { %v100_v60 = vshrl.u32 %v92_v52, 15  ;;  %v101_v61 = vshrl.u32 %v93_v53, 15  ;;  %v102_v62 = vshrl.u32 %v94_v54, 15  ;;  %v103_v63 = vshrl.u32 %v95_v55, 15 }
  0x1a   :  { %v104_v0 = vshrl.u32 %v96_v56, 15  ;;  %v105_v1 = vshrl.u32 %v97_v57, 15  ;;  %v106_v2 = vshrl.u32 %v98_v58, 15  ;;  %v107_v3 = vshrl.u32 %v99_v59, 15 }
  0x1b   :  { %v108_v4 = vxor.u32 %v100_v60, %v92_v52  ;;  %v109_v5 = vxor.u32 %v101_v61, %v93_v53  ;;  %v110_v6 = vxor.u32 %v102_v62, %v94_v54  ;;  %v111_v7 = vxor.u32 %v103_v63, %v95_v55 }
  0x1c   :  { %v112_v8 = vxor.u32 %v104_v0, %v96_v56  ;;  %v113_v9 = vxor.u32 %v105_v1, %v97_v57  ;;  %v114_v10 = vxor.u32 %v106_v2, %v98_v58  ;;  %v115_v11 = vxor.u32 %v107_v3, %v99_v59 }
  0x1d   :  { %v196_v12 = vxor.u32 2147483648, %v108_v4  ;;  %v197_v13 = vxor.u32 2147483648, %v109_v5  ;;  %v198_v14 = vxor.u32 2147483648, %v110_v6  ;;  %v199_v15 = vxor.u32 2147483648, %v111_v7 }
  0x1e   :  { %v200_v17 = vxor.u32 2147483648, %v112_v8  ;;  %v201_v18 = vxor.u32 2147483648, %v113_v9  ;;  %v202_v19 = vxor.u32 2147483648, %v114_v10  ;;  %v203_v20 = vxor.u32 2147483648, %v115_v11 }
  0x1f   :  { %vm281_vm5 = vcmp.lt.s32.totalorder %v196_v12, 0  ;;  %vm285_vm6 = vcmp.lt.s32.totalorder %v197_v13, 0  ;;  %vm289_vm7 = vcmp.lt.s32.totalorder %v198_v14, 0  ;;  %vm293_vm8 = vcmp.lt.s32.totalorder %v199_v15, 0 }
  0x20   :  { %vm297_vm9 = vcmp.lt.s32.totalorder %v200_v17, 0  ;;  %vm301_vm10 = vcmp.lt.s32.totalorder %v201_v18, 0  ;;  %vm305_vm11 = vcmp.lt.s32.totalorder %v202_v19, 0  ;;  %vm309_vm12 = vcmp.lt.s32.totalorder %v203_v20, 0 }
  0x21   :  { %v141_v29 = vperm.slane %v140_v16, 0  ;;  %v142_v30 = vperm.slane %v140_v16, 1  ;;  %v143_v31 = vperm.slane %v140_v16, 2  ;;  %v144_v32 = vperm.slane %v140_v16, 3 }
  0x22   :  { %v145_v33 = vperm.slane %v140_v16, 4  ;;  %v146_v34 = vperm.slane %v140_v16, 5  ;;  %v147_v35 = vperm.slane %v140_v16, 6  ;;  %v148_v36 = vperm.slane %v140_v16, 7 }
  0x23   :  { %v149_v37 = vsel %vm281_vm5, 0, %v141_v29  ;;  %v150_v38 = vsel %vm285_vm6, 0, %v142_v30  ;;  %v151_v39 = vsel %vm289_vm7, 0, %v143_v31  ;;  %v152_v40 = vsel %vm293_vm8, 0, %v144_v32 }
  0x24   :  { %v153_v41 = vsel %vm297_vm9, 0, %v145_v33  ;;  %v154_v42 = vsel %vm301_vm10, 0, %v146_v34  ;;  %v155_v43 = vsel %vm305_vm11, 0, %v147_v35  ;;  %v156_v44 = vsel %vm309_vm12, 0, %v148_v36 }
  0x25   :  { %v157_v45 = vrot.slane %v150_v38, 7  ;;  %v158_v46 = vrot.slane %v151_v39, 6  ;;  %v159_v47 = vrot.slane %v152_v40, 5  ;;  %v160_v48 = vrot.slane %v153_v41, 4 }
  0x26   :  { %v161_v49 = vrot.slane %v154_v42, 3  ;;  %v162_v50 = vrot.slane %v155_v43, 2  ;;  %v163_v51 = vrot.slane %v156_v44, 1 }
  0x27   :  { %v165_v52 = vsel %vm164_vm0, %v149_v37, %v157_v45  ;;  %v167_v53 = vsel %vm166_vm1, %v158_v46, %v159_v47 }
  0x28   :  { %v169_v54 = vsel %vm168_vm2, %v165_v52, %v167_v53  ;;  %v171_v55 = vsel %vm170_vm3, %v160_v48, %v161_v49  ;;  %v173_v56 = vsel %vm172_vm4, %v162_v50, %v163_v51 }
  0x29   :  { %v175_v57 = vsel %vm174_vm13, %v171_v55, %v173_v56 }
  0x2a   :  { %v177_v58 = vsel %vm176_vm14, %v169_v54, %v175_v57 }
  0x2b   :  { %178 = vst [vmem:[#allocation6] sm:$0xff] %v177_v58 }
  0x2c   :  { %189 = dma.vmem_to_hbm [thread:$0]  %s185_s1, 128, %s187_s19, [#allocation5]  }
  0x2d   :  { %256 = dma.done.wait [#allocation5], 128  }
  0x2e   :  { %257 = vsyncadd [#allocation5], 4294967168 }
  0x2f   :  { %194 = vsyncpa [#allocation4], 1 }
  0x30   :  { %195 = vsyncpa [#allocation5], 1 }

</bundles_post_ra>
